<compile_context>
chip_gen: v6e
topology: v6e:2x2x1
jax: 0.10.0
libtpu: 0.0.40
codegen_flags: <defaults>
</compile_context>

<pallas_src>
import numpy as np
import jax
import jax.numpy as jnp
from jax.experimental import pallas as pl
from jax.experimental.pallas import tpu as pltpu

# ----------------------------- configuration --------------------------------
P_OUT = 4            # phase embedding size
D_OUT = 4            # demand embedding size
LANE_EMBED = 16      # lane_embed_units
REL_EMBED = 4        # relation_embed_size
CONV_CH = 20         # hidden conv channels

NUM_PHASES = 8       # output_shape (oshape)
NUM_MOVEMENTS = 12
DEMAND_SHAPE = 1
BATCH = 4

# deterministic phase pairs (indices into the 12 movements)
PHASE_PAIRS = [[0, 6], [1, 7], [2, 8], [3, 9], [4, 10], [5, 11], [0, 3], [6, 9]]


def build_competition_mask(phase_pairs):
    P = len(phase_pairs)
    cm = np.zeros((P, P - 1), np.int32)
    for i in range(P):
        jj = 0
        for j in range(P):
            if j == i:
                continue
            if set(phase_pairs[i]) & set(phase_pairs[j]):
                cm[i, jj] = 1
            jj += 1
    return cm


# ----------------------------- parameters -----------------------------------
def init_params(key, demand_shape):
    ks = jax.random.split(key, 16)

    def nrm(k, shape, scale=0.3):
        return jax.random.normal(k, shape, jnp.float32) * scale

    return dict(
        p_w=nrm(ks[0], (2, P_OUT)),                       # nn.Embedding(2, 4)
        d_w=nrm(ks[1], (D_OUT, demand_shape)),            # nn.Linear(demand, 4)
        d_b=nrm(ks[2], (D_OUT,), 0.05),
        lane_w=nrm(ks[3], (LANE_EMBED, P_OUT + D_OUT)),   # nn.Linear(8, 16)
        lane_b=nrm(ks[4], (LANE_EMBED,), 0.05),
        lane_conv_w=nrm(ks[5], (CONV_CH, 2 * LANE_EMBED)),  # Conv2d(32,20,1x1)
        lane_conv_b=nrm(ks[6], (CONV_CH,), 0.05),
        rel_emb_w=nrm(ks[7], (2, REL_EMBED)),             # nn.Embedding(2, 4)
        rel_conv_w=nrm(ks[8], (CONV_CH, REL_EMBED)),      # Conv2d(4,20,1x1)
        rel_conv_b=nrm(ks[9], (CONV_CH,), 0.05),
        hidden_w=nrm(ks[10], (CONV_CH, CONV_CH)),         # Conv2d(20,20,1x1)
        hidden_b=nrm(ks[11], (CONV_CH,), 0.05),
        merge_w=nrm(ks[12], (1, CONV_CH)),                # Conv2d(20,1,1x1)
        merge_b=nrm(ks[13], (1,), 0.05),
    )


def _round_up(x, m):
    return (x + m - 1) // m * m


# ----------------------------- Pallas kernel --------------------------------
def make_frap_kernel(off, dims):
    """off: name -> (row0, h, w) static offsets into the narrow f32 slab.
    dims: (D, BM, BRp, BP)."""
    D, BM, BRp, BP = dims

    def kernel(inp_ref, lr_ref, rel_ref, slab_ref, out_ref):
        dot = lambda a, b: jnp.dot(a, b, preferred_element_type=jnp.float32)

        def sl(name):
            r0, h, w = off[name]
            return slab_ref[r0:r0 + h, 0:w]

        inp = inp_ref[0]                                  # [1+D, BM] (row0=phase sel, rest=demand)

        w_in = sl('w_in')                                 # [8, 1+D]  fused phase-interp + demand Linear
        b_in = sl('b_in')                                 # [8, 1]
        w_ln = sl('w_lane')                               # [16, 8]
        b_ln = sl('b_lane')                               # [16, 1]
        w_lcL = sl('w_lcL')                               # [20, 16]  lane_conv (left half of channels)
        w_lcR = sl('w_lcR')                               # [20, 16]  lane_conv (right half)
        b_lc = sl('b_lconv')                              # [20, 1]
        w_h = sl('w_hidden')                              # [20, 20]
        b_h = sl('b_hidden')                              # [20, 1]
        w_m = sl('w_merge')                               # [1, 20]
        b_m = sl('b_merge')                               # [1, 1]
        gsum = sl('gsum')                                 # [BRp, BP] block-diag phase-sum (zero pad rows)

        # first affine has K = 1+D (tiny): do it on the VPU as broadcast outer products,
        # skipping the MXU push/drain at the head of the dependent chain.
        z = w_in[:, 0:1] * inp[0:1, :]                    # [8, BM]
        for k in range(1, 1 + D):
            z = z + w_in[:, k:k + 1] * inp[k:k + 1, :]
        cat = jax.nn.sigmoid(z + b_in)                    # [8, BM]  sigmoid(phase emb) || sigmoid(demand)

        # lane_embedding + relu                           -> [16, BM]
        pd = jax.nn.relu(dot(w_ln, cat) + b_ln)

        # pair-sum + (i, j) rotation via a single combined bf16 selector matmul;
        # split point is lane-aligned at BRp (multiple of 128), so slices are free.
        lr = dot(pd, lr_ref[...].astype(jnp.float32))     # [16, 2*BRp]
        left = lr[:, :BRp]                                # [16, BRp]
        right = lr[:, BRp:]                               # [16, BRp]

        # lane_conv (1x1) + relu, with the concat folded into two accumulating dots
        x = jax.nn.relu(dot(w_lcL, left) + dot(w_lcR, right) + b_lc)   # [20, BRp]
        comb = x * rel_ref[...]                           # [20, BRp] (rel zero-padded past BR)
        h = jax.nn.relu(dot(w_h, comb) + b_h)             # [20, BRp]
        m = dot(w_m, h) + b_m                             # [1,  BRp]
        # sum over the (P-1) rotated slots of each phase -> lane-dense row
        # (padded lanes have zero gsum rows, so they contribute nothing)
        out_ref[0] = dot(m, gsum)                         # [1,  BP]

    return kernel


# ----------------------------- wrapper (glue) --------------------------------
def frap_pallas(params, states, phase_pairs, comp_mask, demand_shape, oshape,
                one_hot=False, num_batch_blocks=1):
    assert not one_hot  # TODO(synk): one_hot=True branch (acts already one-hot / soft) not exercised here
    B = states.shape[0]
    M = (states.shape[1] - 1) // demand_shape
    P = oshape
    R = P * (P - 1)
    D = demand_shape
    # num_batch_blocks > 1 (marked "parallel") lets v7x's 2 TensorCores split the batch;
    # default 1 = single fused invocation (best at small B; each TC would otherwise pull
    # its own copy of the constant slabs).
    assert B % num_batch_blocks == 0
    G = num_batch_blocks
    Bb = B // G
    BM, BR, BP = Bb * M, Bb * R, Bb * P
    BRp = _round_up(BR, 128)                              # lane-aligned phase-grid width

    # --- data-dependent glue (exactly the PyTorch semantics) ---
    acts = states[:, 0].astype(jnp.int32)
    s = states[:, 1:].astype(jnp.float32)
    pp = jnp.asarray(phase_pairs, jnp.int32)                      # [P, 2]
    sel = pp[acts]                                                # [B, 2]
    ext = jnp.zeros((B, M), jnp.float32)
    ext = ext.at[jnp.arange(B)[:, None], sel].set(1.0)            # one-hot selected pair
    # demand windows exactly as torch: states[:, i:i+demand_shape]
    dem = jnp.stack([s[:, i:i + D] for i in range(M)], axis=1)    # [B, M, D]

    # channels-first, batch folded into lanes: inp[g, 0, b*M+m] = ext, rows 1:1+D = demand
    ext_r = ext.reshape(G, 1, BM)
    dem_r = jnp.transpose(dem.reshape(G, Bb, M, D), (0, 3, 1, 2)).reshape(G, D, BM)
    inp = jnp.concatenate([ext_r, dem_r], axis=1)                 # [G, 1+D, BM]

    # --- static selectors (numpy, compile-time constants) ---
    psel = np.zeros((P, M), np.float32)
    for p, (a, b) in enumerate(phase_pairs):
        psel[p, a] += 1.0
        psel[p, b] += 1.0
    lsel_pr = np.zeros((R, P), np.float32)
    rsel_pr = np.zeros((R, P), np.float32)
    gsum = np.zeros((P, R), np.float32)
    relh = np.zeros((R, 2), np.float32)
    cm_flat = np.asarray(comp_mask).reshape(-1)
    r = 0
    for i in range(P):
        for j in range(P):
            if i != j:
                lsel_pr[r, i] = 1.0
                rsel_pr[r, j] = 1.0
                gsum[i, r] = 1.0
                relh[r, cm_flat[r]] = 1.0
                r += 1
    LS = lsel_pr @ psel                                           # [R, M] = left-phase movement sum
    RS = rsel_pr @ psel                                           # [R, M]
    eye = np.eye(Bb, dtype=np.float32)
    lsel_bd = np.kron(eye, LS.T)                                  # [BM, BR]
    rsel_bd = np.kron(eye, RS.T)                                  # [BM, BR]
    gsum_bd = np.kron(eye, gsum.T)                                # [BR, BP]

    # combined lane-padded left|right selector, stored bf16 (0/1 values are exact in bf16)
    lr_np = np.zeros((BM, 2 * BRp), np.float32)
    lr_np[:, :BR] = lsel_bd
    lr_np[:, BRp:BRp + BR] = rsel_bd
    lr_sel = jnp.asarray(lr_np, jnp.bfloat16)                     # [BM, 2*BRp]

    # --- relation path hoisted out of the kernel (input-independent), kept f32 ---
    rel_e = jax.nn.relu(jnp.asarray(relh) @ params['rel_emb_w'])               # [R, 4]
    rel = jax.nn.relu(rel_e @ params['rel_conv_w'].T + params['rel_conv_b'])   # [R, 20]
    rel_t = jnp.zeros((CONV_CH, BRp), jnp.float32).at[:, :BR].set(
        jnp.tile(rel.T, (1, Bb)))                                              # [20, BRp]

    # --- fused input affine: rows 0:4 = phase-embedding interpolation, 4:8 = demand Linear ---
    # (ext is an exact 0/1 one-hot, so pw0 + ext*(pw1-pw0) == Embedding(2,4)(ext))
    pw = params['p_w']
    w_in = jnp.zeros((P_OUT + D_OUT, 1 + D), jnp.float32)
    w_in = w_in.at[:P_OUT, 0].set(pw[1] - pw[0])
    w_in = w_in.at[P_OUT:, 1:].set(params['d_w'])
    b_in = jnp.concatenate([pw[0], params['d_b']])[:, None]                    # [8, 1]

    # phase-sum selector padded to BRp rows (extra rows zero -> padded lanes drop out)
    gsum_p = jnp.zeros((BRp, BP), jnp.float32).at[:BR, :].set(jnp.asarray(gsum_bd))

    # --- narrow f32 slab: all tiny weights + gsum, width = true max column count (~32) ---
    entries = [
        ('w_in', w_in), ('b_in', b_in),
        ('w_lane', params['lane_w']), ('b_lane', params['lane_b'][:, None]),
        ('w_lcL', params['lane_conv_w'][:, :LANE_EMBED]),
        ('w_lcR', params['lane_conv_w'][:, LANE_EMBED:]),
        ('b_lconv', params['lane_conv_b'][:, None]),
        ('w_hidden', params['hidden_w']), ('b_hidden', params['hidden_b'][:, None]),
        ('w_merge', params['merge_w']), ('b_merge', params['merge_b'][:, None]),
        ('gsum', gsum_p),
    ]
    width = max(int(a.shape[1]) for _, a in entries)
    off = {}
    bands = []
    row = 0
    for name, arr in entries:
        arr = jnp.asarray(arr, jnp.float32)
        h, w = int(arr.shape[0]), int(arr.shape[1])
        off[name] = (row, h, w)
        hb = _round_up(h, 8)                                      # 8-aligned row bands
        band = jnp.zeros((hb, width), jnp.float32).at[:h, :w].set(arr)
        bands.append(band)
        row += hb
    slab = jnp.concatenate(bands, axis=0)                         # [rows, width]

    kernel = make_frap_kernel(off, (D, BM, BRp, BP))

    out = pl.pallas_call(
        kernel,
        out_shape=jax.ShapeDtypeStruct((G, 1, BP), jnp.float32),
        grid=(G,),
        in_specs=[
            pl.BlockSpec((1, 1 + D, BM), lambda g: (g, 0, 0)),    # per-block inputs
            pl.BlockSpec(lr_sel.shape, lambda g: (0, 0)),         # bf16 selector slab (constant)
            pl.BlockSpec(rel_t.shape, lambda g: (0, 0)),          # f32 relation constants
            pl.BlockSpec(slab.shape, lambda g: (0, 0)),           # narrow f32 weight slab
        ],
        out_specs=pl.BlockSpec((1, 1, BP), lambda g: (g, 0, 0)),
        compiler_params=pltpu.CompilerParams(
            dimension_semantics=("parallel",)),
    )(inp, lr_sel, rel_t, slab)

    q_values = out.reshape(B, P)                                  # [B, P]
    # TODO(synk): DiscreteActionValueHead just wraps q_values in a distribution
    # object (argmax / max live outside the forward compute); return raw Q.
    return q_values


# ----------------------------- pure-JAX reference ----------------------------
def frap_reference(params, states, phase_pairs, comp_mask, demand_shape, oshape):
    B = states.shape[0]
    M = (states.shape[1] - 1) // demand_shape
    acts = states[:, 0].astype(jnp.int32)
    s = states[:, 1:].astype(jnp.float32)
    pp = jnp.asarray(phase_pairs, jnp.int32)
    sel = pp[acts]
    ext = jnp.zeros((B, M), jnp.int32).at[jnp.arange(B)[:, None], sel].set(1)
    phase_embeds = jax.nn.sigmoid(params['p_w'][ext])             # [B, M, 4]
    pds = []
    for i in range(M):
        phase = phase_embeds[:, i]
        demand = jax.nn.sigmoid(s[:, i:i + demand_shape] @ params['d_w'].T + params['d_b'])
        cat = jnp.concatenate([phase, demand], -1)
        pds.append(jax.nn.relu(cat @ params['lane_w'].T + params['lane_b']))
    pd = jnp.stack(pds, 1)                                        # [B, M, 16]
    pairs = [pd[:, a] + pd[:, b] for a, b in phase_pairs]
    rot = []
    for i in range(len(pairs)):
        for j in range(len(pairs)):
            if i != j:
                rot.append(jnp.concatenate([pairs[i], pairs[j]], -1))
    rot = jnp.stack(rot, 1).reshape(B, oshape, oshape - 1, 2 * LANE_EMBED)
    rot = jax.nn.relu(jnp.einsum('bhwc,oc->bhwo', rot, params['lane_conv_w'])
                      + params['lane_conv_b'])
    relations = jax.nn.relu(params['rel_emb_w'][jnp.asarray(comp_mask)])
    relations = jax.nn.relu(jnp.einsum('hwc,oc->hwo', relations, params['rel_conv_w'])
                            + params['rel_conv_b'])
    comb = rot * relations[None]
    comb = jax.nn.relu(jnp.einsum('bhwc,oc->bhwo', comb, params['hidden_w'])
                       + params['hidden_b'])
    comb = jnp.einsum('bhwc,oc->bhwo', comb, params['merge_w']) + params['merge_b']
    return comb.reshape(B, oshape, oshape - 1).sum(-1)            # [B, P]


# --------------------------------- main --------------------------------------
if __name__ == "__main__":
    key = jax.random.PRNGKey(0)
    kp, ka, kd = jax.random.split(key, 3)

    params = init_params(kp, DEMAND_SHAPE)
    comp_mask = build_competition_mask(PHASE_PAIRS)

    # states: [agents, ob_length] = [B, 1 + M*demand_shape]
    acts = jax.random.randint(ka, (BATCH,), 0, NUM_PHASES)
    demand_vals = jax.random.uniform(kd, (BATCH, NUM_MOVEMENTS * DEMAND_SHAPE),
                                     jnp.float32) * 3.0
    states = jnp.concatenate([acts.astype(jnp.float32)[:, None], demand_vals], axis=1)

    q_pallas = frap_pallas(params, states, PHASE_PAIRS, comp_mask,
                           DEMAND_SHAPE, NUM_PHASES, num_batch_blocks=1)
    q_pallas = jax.block_until_ready(q_pallas)

    q_ref = jax.block_until_ready(
        frap_reference(params, states, PHASE_PAIRS, comp_mask,
                       DEMAND_SHAPE, NUM_PHASES))

    np.testing.assert_allclose(np.asarray(q_pallas), np.asarray(q_ref),
                               rtol=1e-3, atol=1e-3)
    print("KERNEL_OK")
</pallas_src>

<mosaic_0001>
module attributes {stable_mosaic.version = 11 : i64} {
  func.func @kernel(%arg0: i32, %arg1: memref<1x2x48xf32, #tpu.memory_space<vmem>>, %arg2: memref<48x512xbf16, #tpu.memory_space<vmem>>, %arg3: memref<20x256xf32, #tpu.memory_space<vmem>>, %arg4: memref<440x32xf32, #tpu.memory_space<vmem>>, %arg5: memref<1x1x32xf32, #tpu.memory_space<vmem>>) attributes {dimension_semantics = [#tpu.dimension_semantics<parallel>], iteration_bounds = array<i64: 1>, scalar_prefetch = 0 : i64, scratch_operands = 0 : i64, tpu.core_type = #tpu.core_type<tc>, window_params = [{transform_indices = @transform_0, window_bounds = array<i64: 1, 2, 48>}, {pipeline_mode = #tpu.pipeline_mode<synchronous>, transform_indices = @transform_1, window_bounds = array<i64: 48, 512>}, {pipeline_mode = #tpu.pipeline_mode<synchronous>, transform_indices = @transform_2, window_bounds = array<i64: 20, 256>}, {pipeline_mode = #tpu.pipeline_mode<synchronous>, transform_indices = @transform_3, window_bounds = array<i64: 440, 32>}, {transform_indices = @transform_4, window_bounds = array<i64: 1, 1, 32>}]} {
    %c0 = arith.constant 0 : index
    %c0_0 = arith.constant 0 : index
    %c0_1 = arith.constant 0 : index
    %0 = vector.load %arg1[%c0, %c0_0, %c0_1] : memref<1x2x48xf32, #tpu.memory_space<vmem>>, vector<1x2x48xf32>
    %1 = vector.shape_cast %0 : vector<1x2x48xf32> to vector<2x48xf32>
    %c0_2 = arith.constant 0 : index
    %c0_3 = arith.constant 0 : index
    %2 = vector.load %arg4[%c0_2, %c0_3] : memref<440x32xf32, #tpu.memory_space<vmem>>, vector<8x2xf32>
    %c8 = arith.constant 8 : index
    %c0_4 = arith.constant 0 : index
    %3 = vector.load %arg4[%c8, %c0_4] : memref<440x32xf32, #tpu.memory_space<vmem>>, vector<8x1xf32>
    %c16 = arith.constant 16 : index
    %c0_5 = arith.constant 0 : index
    %4 = vector.load %arg4[%c16, %c0_5] : memref<440x32xf32, #tpu.memory_space<vmem>>, vector<16x8xf32>
    %c32 = arith.constant 32 : index
    %c0_6 = arith.constant 0 : index
    %5 = vector.load %arg4[%c32, %c0_6] : memref<440x32xf32, #tpu.memory_space<vmem>>, vector<16x1xf32>
    %c48 = arith.constant 48 : index
    %c0_7 = arith.constant 0 : index
    %6 = vector.load %arg4[%c48, %c0_7] : memref<440x32xf32, #tpu.memory_space<vmem>>, vector<20x16xf32>
    %c72 = arith.constant 72 : index
    %c0_8 = arith.constant 0 : index
    %7 = vector.load %arg4[%c72, %c0_8] : memref<440x32xf32, #tpu.memory_space<vmem>>, vector<20x16xf32>
    %c96 = arith.constant 96 : index
    %c0_9 = arith.constant 0 : index
    %8 = vector.load %arg4[%c96, %c0_9] : memref<440x32xf32, #tpu.memory_space<vmem>>, vector<20x1xf32>
    %c120 = arith.constant 120 : index
    %c0_10 = arith.constant 0 : index
    %9 = vector.load %arg4[%c120, %c0_10] : memref<440x32xf32, #tpu.memory_space<vmem>>, vector<20x20xf32>
    %c144 = arith.constant 144 : index
    %c0_11 = arith.constant 0 : index
    %10 = vector.load %arg4[%c144, %c0_11] : memref<440x32xf32, #tpu.memory_space<vmem>>, vector<20x1xf32>
    %c168 = arith.constant 168 : index
    %c0_12 = arith.constant 0 : index
    %11 = vector.load %arg4[%c168, %c0_12] : memref<440x32xf32, #tpu.memory_space<vmem>>, vector<1x20xf32>
    %c176 = arith.constant 176 : index
    %c0_13 = arith.constant 0 : index
    %12 = vector.load %arg4[%c176, %c0_13] : memref<440x32xf32, #tpu.memory_space<vmem>>, vector<1x1xf32>
    %c184 = arith.constant 184 : index
    %c0_14 = arith.constant 0 : index
    %13 = vector.load %arg4[%c184, %c0_14] : memref<440x32xf32, #tpu.memory_space<vmem>>, vector<256x32xf32>
    %14 = vector.extract_strided_slice %2 {offsets = [0, 0], sizes = [8, 1], strides = [1, 1]} : vector<8x2xf32> to vector<8x1xf32>
    %15 = vector.extract_strided_slice %1 {offsets = [0, 0], sizes = [1, 48], strides = [1, 1]} : vector<2x48xf32> to vector<1x48xf32>
    %16 = vector.broadcast %14 : vector<8x1xf32> to vector<8x48xf32>
    %17 = vector.broadcast %15 : vector<1x48xf32> to vector<8x48xf32>
    %18 = arith.mulf %16, %17 : vector<8x48xf32>
    %19 = vector.extract_strided_slice %2 {offsets = [0, 1], sizes = [8, 1], strides = [1, 1]} : vector<8x2xf32> to vector<8x1xf32>
    %20 = vector.extract_strided_slice %1 {offsets = [1, 0], sizes = [1, 48], strides = [1, 1]} : vector<2x48xf32> to vector<1x48xf32>
    %21 = vector.broadcast %19 : vector<8x1xf32> to vector<8x48xf32>
    %22 = vector.broadcast %20 : vector<1x48xf32> to vector<8x48xf32>
    %23 = arith.mulf %21, %22 : vector<8x48xf32>
    %24 = arith.addf %18, %23 : vector<8x48xf32>
    %25 = vector.broadcast %3 : vector<8x1xf32> to vector<8x48xf32>
    %26 = arith.addf %24, %25 : vector<8x48xf32>
    %27 = arith.negf %26 : vector<8x48xf32>
    %28 = math.exp %27 : vector<8x48xf32>
    %cst = arith.constant 1.000000e+00 : f32
    %29 = vector.broadcast %cst : f32 to vector<8x48xf32>
    %30 = arith.addf %29, %28 : vector<8x48xf32>
    %31 = arith.divf %29, %30 : vector<8x48xf32>
    %cst_15 = arith.constant dense<0.000000e+00> : vector<16x48xf32>
    %32 = tpu.matmul %4, %31, %cst_15 {dimension_numbers = #tpu.dot_dimension_numbers<[1], [0], [0], [1], [0, 0, 1, 1], [], []>} : vector<16x8xf32>, vector<8x48xf32>, vector<16x48xf32> -> vector<16x48xf32>
    %33 = vector.broadcast %5 : vector<16x1xf32> to vector<16x48xf32>
    %34 = arith.addf %32, %33 : vector<16x48xf32>
    %cst_16 = arith.constant 0.000000e+00 : f32
    %35 = vector.broadcast %cst_16 : f32 to vector<16x48xf32>
    %36 = arith.maximumf %34, %35 : vector<16x48xf32>
    %c0_17 = arith.constant 0 : index
    %c0_18 = arith.constant 0 : index
    %37 = vector.load %arg2[%c0_17, %c0_18] : memref<48x512xbf16, #tpu.memory_space<vmem>>, vector<48x512xbf16>
    %38 = arith.extf %37 : vector<48x512xbf16> to vector<48x512xf32>
    %cst_19 = arith.constant dense<0.000000e+00> : vector<16x512xf32>
    %39 = tpu.matmul %36, %38, %cst_19 {dimension_numbers = #tpu.dot_dimension_numbers<[1], [0], [0], [1], [0, 0, 1, 1], [], []>} : vector<16x48xf32>, vector<48x512xf32>, vector<16x512xf32> -> vector<16x512xf32>
    %40 = vector.extract_strided_slice %39 {offsets = [0, 0], sizes = [16, 256], strides = [1, 1]} : vector<16x512xf32> to vector<16x256xf32>
    %41 = vector.extract_strided_slice %39 {offsets = [0, 256], sizes = [16, 256], strides = [1, 1]} : vector<16x512xf32> to vector<16x256xf32>
    %cst_20 = arith.constant dense<0.000000e+00> : vector<20x256xf32>
    %42 = tpu.matmul %6, %40, %cst_20 {dimension_numbers = #tpu.dot_dimension_numbers<[1], [0], [0], [1], [0, 0, 1, 1], [], []>} : vector<20x16xf32>, vector<16x256xf32>, vector<20x256xf32> -> vector<20x256xf32>
    %cst_21 = arith.constant dense<0.000000e+00> : vector<20x256xf32>
    %43 = tpu.matmul %7, %41, %cst_21 {dimension_numbers = #tpu.dot_dimension_numbers<[1], [0], [0], [1], [0, 0, 1, 1], [], []>} : vector<20x16xf32>, vector<16x256xf32>, vector<20x256xf32> -> vector<20x256xf32>
    %44 = arith.addf %42, %43 : vector<20x256xf32>
    %45 = vector.broadcast %8 : vector<20x1xf32> to vector<20x256xf32>
    %46 = arith.addf %44, %45 : vector<20x256xf32>
    %cst_22 = arith.constant 0.000000e+00 : f32
    %47 = vector.broadcast %cst_22 : f32 to vector<20x256xf32>
    %48 = arith.maximumf %46, %47 : vector<20x256xf32>
    %c0_23 = arith.constant 0 : index
    %c0_24 = arith.constant 0 : index
    %49 = vector.load %arg3[%c0_23, %c0_24] : memref<20x256xf32, #tpu.memory_space<vmem>>, vector<20x256xf32>
    %50 = arith.mulf %48, %49 : vector<20x256xf32>
    %cst_25 = arith.constant dense<0.000000e+00> : vector<20x256xf32>
    %51 = tpu.matmul %9, %50, %cst_25 {dimension_numbers = #tpu.dot_dimension_numbers<[1], [0], [0], [1], [0, 0, 1, 1], [], []>} : vector<20x20xf32>, vector<20x256xf32>, vector<20x256xf32> -> vector<20x256xf32>
    %52 = vector.broadcast %10 : vector<20x1xf32> to vector<20x256xf32>
    %53 = arith.addf %51, %52 : vector<20x256xf32>
    %cst_26 = arith.constant 0.000000e+00 : f32
    %54 = vector.broadcast %cst_26 : f32 to vector<20x256xf32>
    %55 = arith.maximumf %53, %54 : vector<20x256xf32>
    %cst_27 = arith.constant dense<0.000000e+00> : vector<1x256xf32>
    %56 = tpu.matmul %11, %55, %cst_27 {dimension_numbers = #tpu.dot_dimension_numbers<[1], [0], [0], [1], [0, 0, 1, 1], [], []>} : vector<1x20xf32>, vector<20x256xf32>, vector<1x256xf32> -> vector<1x256xf32>
    %57 = vector.broadcast %12 : vector<1x1xf32> to vector<1x256xf32>
    %58 = arith.addf %56, %57 : vector<1x256xf32>
    %cst_28 = arith.constant dense<0.000000e+00> : vector<1x32xf32>
    %59 = tpu.matmul %58, %13, %cst_28 {dimension_numbers = #tpu.dot_dimension_numbers<[1], [0], [0], [1], [0, 0, 1, 1], [], []>} : vector<1x256xf32>, vector<256x32xf32>, vector<1x32xf32> -> vector<1x32xf32>
    %c0_29 = arith.constant 0 : index
    %c0_30 = arith.constant 0 : index
    %c0_31 = arith.constant 0 : index
    %60 = vector.load %arg5[%c0_29, %c0_30, %c0_31] : memref<1x1x32xf32, #tpu.memory_space<vmem>>, vector<1x1x32xf32>
    %61 = vector.shape_cast %60 : vector<1x1x32xf32> to vector<1x32xf32>
    %62 = vector.shape_cast %59 : vector<1x32xf32> to vector<1x1x32xf32>
    tpu.vector_store %arg5[%c0_29, %c0_30, %c0_31], %62 {strides = array<i32>} : memref<1x1x32xf32, #tpu.memory_space<vmem>>, vector<1x1x32xf32>,
    return
  }
  func.func @transform_0(%arg0: i32) -> (i32, i32, i32) {
    %c0_i32 = arith.constant 0 : i32
    %c0_i32_0 = arith.constant 0 : i32
    %c0_i32_1 = arith.constant 0 : i32
    return %arg0, %c0_i32, %c0_i32_0 : i32, i32, i32
  }
  func.func @transform_1(%arg0: i32) -> (i32, i32) {
    %c0_i32 = arith.constant 0 : i32
    %c0_i32_0 = arith.constant 0 : i32
    %c0_i32_1 = arith.constant 0 : i32
    return %c0_i32, %c0_i32_0 : i32, i32
  }
  func.func @transform_2(%arg0: i32) -> (i32, i32) {
    %c0_i32 = arith.constant 0 : i32
    %c0_i32_0 = arith.constant 0 : i32
    %c0_i32_1 = arith.constant 0 : i32
    return %c0_i32, %c0_i32_0 : i32, i32
  }
  func.func @transform_3(%arg0: i32) -> (i32, i32) {
    %c0_i32 = arith.constant 0 : i32
    %c0_i32_0 = arith.constant 0 : i32
    %c0_i32_1 = arith.constant 0 : i32
    return %c0_i32, %c0_i32_0 : i32, i32
  }
  func.func @transform_4(%arg0: i32) -> (i32, i32, i32) {
    %c0_i32 = arith.constant 0 : i32
    %c0_i32_0 = arith.constant 0 : i32
    %c0_i32_1 = arith.constant 0 : i32
    return %arg0, %c0_i32, %c0_i32_0 : i32, i32, i32
  }
}

</mosaic_0001>

<bundles_post_ra>
// kernel: tpu_custom_call.1
= control target key start
LH: loop header
LB: loop body
LE: loop exit
PB: predicated region body
PF: predicated region fallthrough
CT: control target
= control target key end

     0   :  { %v1011_v2 = vmov 0   ;;  %s1299_s0 = inlined_call_operand.vmem [shape: f32[1,2,48], index: 0, kind: input, shape index: {}]   ;;  %s1300_s1 = inlined_call_operand.vmem [shape: bf16[48,512], index: 1, kind: input, shape index: {}]   ;;  %s1301_s2 = inlined_call_operand.vmem [shape: f32[20,256], index: 2, kind: input, shape index: {}]   ;;  %s1302_s3 = inlined_call_operand.vmem [shape: f32[440,32], index: 3, kind: input, shape index: {}]   ;;  %s1303_s4 = inlined_call_operand.hbm [shape: f32[1,1,32], index: 4, kind: output, shape index: {}]  }
   0x1   :  { %v20_v0 = vld [vmem:[%s1302_s3 + $0x8] sm:$0xff]  ;;  %v19_v1 = vld [vmem:[%s1302_s3] sm:$0xff]  ;;  %983 = vset.pattern.permute.xlu1 %v1011_v2  ;;  %981 = vset.pattern.permute.xlu0 %v1011_v2 }
   0x2   :  { %96 = vperm.xlu1 %983, %v20_v0   ;;  %76 = vperm.xlu0 %981, %v19_v1   ;;  %v23_v3 = vld [vmem:[%s1302_s3 + $0x20] sm:$0xff] }
   0x3   :  { %9 = vsyncpa [#allocation3], 0  ;;  %v1012_v4 = vmov 1   ;;  %v24_v5 = vld [vmem:[%s1302_s3 + $0x28] sm:$0xff]  ;;  %v31_v7 = vld [vmem:[%s1302_s3 + $0x60] sm:$0xff]  ;;  %vm116_vm0 = vcmask 64512   ;;  %v79_v11 = vlaneseq }
   0x4   :  { %v32_v6 = vld [vmem:[%s1302_s3 + $0x68] sm:$0xff]  ;;  %v38_v8 = vld [vmem:[%s1302_s3 + $0x98] sm:$0xff]  ;;  %v41_v9 = vld [vmem:[%s1302_s3 + $0xb0] sm:$0x1]  ;;  %v1013_v50 = vmov 0.0   ;;  %vm236_vm1 = vcmask 392192  }
   0x5   :  { %v21_v10 = vld [vmem:[%s1302_s3 + $0x10] sm:$0xff]  ;;  %v80_v12 = vshrl.u32 %v79_v11, 7  ;;  %v18_v15 = vld [vmem:[%s1299_s0] sm:$0x3]  ;;  %v22_v32 = vld [vmem:[%s1302_s3 + $0x18] sm:$0xff]  ;;  %471 = vmatprep.mubr.f32.mxu1 %v1013_v50  ;;  %vm397_vm2 = vcmask 130048  }
   0x6   :  { %108 = vperm.xlu1 %983, %v23_v3   ;;  %982 = vset.pattern.permute.xlu0 %v1012_v4  ;;  %v210_v28 = vld [vmem:[%s1300_s1 + $0x50] sm:$0xff]  ;;  %v208_v29 = vld [vmem:[%s1300_s1 + $0x40] sm:$0xff]  ;;  %v211_v48 = vld [vmem:[%s1300_s1 + $0x58] sm:$0xff]  ;;  %vm646_vm3 = vcmask 1043456   ;;  %vm636_vm4 = vcmask 162816   ;;  %s1014_s21 = smov [#allocation2]  }
   0x7   :  { %85 = vperm.xlu0 %982, %v19_v1   ;;  %974 = vmatprep.mubr.msk.f32.mxu0 %vm116_vm0, %v21_v10  ;;  %v81_v13 = vsub.s32 0, %v80_v12  ;;  %v90_v14 = vsub.s32 1, %v80_v12  ;;  %v233_v30 = vunpack.c.h.bf16 %v210_v28  ;;  %v232_v33 = vunpack.c.l.bf16 %v210_v28  ;;  %v206_v34 = vld [vmem:[%s1300_s1 + $0x30] sm:$0xff]  ;;  %v204_v39 = vld [vmem:[%s1300_s1 + $0x20] sm:$0xff]  ;;  %v209_v54 = vld [vmem:[%s1300_s1 + $0x48] sm:$0xff]  ;;  %s905_s22 = sshll.u32 %s1014_s21, 4  ;;  %s906_s22 = int_to_ptr.vmem [resolvable:$true] %s905_s22 }
   0x8   :  { %v229_v35 = vunpack.c.h.bf16 %v208_v29  ;;  %v228_v36 = vunpack.c.l.bf16 %v208_v29  ;;  %v225_v37 = vunpack.c.h.bf16 %v206_v34  ;;  %v224_v38 = vunpack.c.l.bf16 %v206_v34  ;;  %v202_v42 = vld [vmem:[%s1300_s1 + $0x10] sm:$0xff]  ;;  %v200_v45 = vld [vmem:[%s1300_s1] sm:$0xff]  ;;  %v207_v58 = vld [vmem:[%s1300_s1 + $0x38] sm:$0xff]  ;;  %s989_s23 = scalar_lea.vmem %s906_s22, 16  ;;  %p994_p1 = scmp.lt.s32.totalorder %s906_s22, %s906_s22 }
   0x9   :  { %v82_v17 = vrot.slane %v18_v15, %v81_v13  ;;  %v91_v18 = vrot.slane %v18_v15, %v90_v14  ;;  %v221_v40 = vunpack.c.h.bf16 %v204_v39  ;;  %v220_v41 = vunpack.c.l.bf16 %v204_v39  ;;  %v205_v63 = vld [vmem:[%s1300_s1 + $0x28] sm:$0xff]  ;;  %v33_v11 = vld [vmem:[%s1302_s3 + $0x70] sm:$0xf]  ;;  %v39_v12 = vld [vmem:[%s1302_s3 + $0xa0] sm:$0xf]  ;;  %p990_p0 = scmp.ne.s32.totalorder %s906_s22, %s989_s23 }
   0xa   :  { %113 = vperm.xlu1 %983, %v24_v5   ;;  %v217_v43 = vunpack.c.h.bf16 %v202_v42  ;;  %v216_v44 = vunpack.c.l.bf16 %v202_v42  ;;  %v213_v46 = vunpack.c.h.bf16 %v200_v45  ;;  %v212_v47 = vunpack.c.l.bf16 %v200_v45  ;;  %v37_v13 = vld [vmem:[%s1302_s3 + $0x90] sm:$0xff] }
   0xb   :  { %984 = vset.pattern.permute.xlu0 %v1011_v2  ;;  %v235_v49 = vunpack.c.h.bf16 %v211_v48  ;;  %v234_v57 = vunpack.c.l.bf16 %v211_v48  ;;  %v231_v61 = vunpack.c.h.bf16 %v209_v54  ;;  %v230_v62 = vunpack.c.l.bf16 %v209_v54  ;;  %v203_v2 = vld [vmem:[%s1300_s1 + $0x18] sm:$0xff] }
   0xc   :  { %v227_v0 = vunpack.c.h.bf16 %v207_v58  ;;  %v226_v1 = vunpack.c.l.bf16 %v207_v58  ;;  %v223_v4 = vunpack.c.h.bf16 %v205_v63  ;;  %v222_v5 = vunpack.c.l.bf16 %v205_v63  ;;  %594 = vperm.xlu0 %984, %v33_v11   ;;  %v35_v11 = vld [vmem:[%s1302_s3 + $0x80] sm:$0xff] }
   0xd   :  { %vm897_vm5 = vcmask 253952  }
   0xe   :  { %589 = vperm.xlu1 %983, %v32_v6   ;;  %v201_v6 = vld [vmem:[%s1300_s1 + $0x8] sm:$0xff] }
   0xf   :  { %v214_v10 = vunpack.c.l.bf16 %v201_v6 }
  0x10   :  { %633 = vperm.xlu0 %984, %v39_v12   ;;  %v36_v12 = vld [vmem:[%s1302_s3 + $0x88] sm:$0xf] }
  0x12   :  { %584 = vperm.xlu1 %983, %v31_v7   ;;  %v219_v7 = vunpack.c.h.bf16 %v203_v2 }
  0x14   :  { %623 = vperm.xlu0 %984, %v37_v13   ;;  %v73_v13 = vld [vmem:[%s1302_s3 + $0x1b0] sm:$0xff] }
  0x16   :  { %628 = vperm.xlu1 %983, %v38_v8   ;;  %v218_v8 = vunpack.c.l.bf16 %v203_v2 }
  0x1a   :  { %744 = vperm.xlu1 %983, %v41_v9   ;;  %v215_v9 = vunpack.c.h.bf16 %v201_v6 }
  0x7d   :  { %v77_v16 = vpop.permute.xlu0 %76  ;;  %v97_v23 = vpop.permute.xlu1 %96 }
  0x7e   :  { %v83_v20 = vmul.f32 %v82_v17, %v77_v16 }
  0x81   :  { %v109_v51 = vpop.permute.xlu1 %108 }
  0x82   :  { %v86_v19 = vpop.permute.xlu0 %85 }
  0x83   :  { %v92_v21 = vmul.f32 %v91_v18, %v86_v19  ;;  %v25_v18 = vld [vmem:[%s1302_s3 + $0x30] sm:$0xff] }
  0x85   :  { %v93_v22 = vadd.f32 %v92_v21, %v83_v20  ;;  %v114_v56 = vpop.permute.xlu1 %113  ;;  %v26_v20 = vld [vmem:[%s1302_s3 + $0x38] sm:$0xff] }
  0x87   :  { %v99_v24 = vadd.f32 %v97_v23, %v93_v22  ;;  %v27_v23 = vld [vmem:[%s1302_s3 + $0x40] sm:$0xf]  ;;  %v595_v42 = vpop.permute.xlu0 %594 }
  0x89   :  { %v913_v25 = vmul.f32 -1.442695, %v99_v24 }
  0x8b   :  { %985 = vpow2.f32 %v913_v25  ;;  %v28_v25 = vld [vmem:[%s1302_s3 + $0x48] sm:$0xff] }
  0x98   :  { %v986_v26 = vpop.eup %985 }
  0x99   :  { %v103_v27 = vadd.f32 1.0, %v986_v26  ;;  %v29_v26 = vld [vmem:[%s1302_s3 + $0x50] sm:$0xff] }
  0x9b   :  { %987 = vrcp.f32 %v103_v27  ;;  %v30_v27 = vld [vmem:[%s1302_s3 + $0x58] sm:$0xf] }
  0xa8   :  { %v988_v31 = vpop.eup %987 }
  0xa9   :  { %972 = vmatprep.subr.mxu0 %v988_v31 }
  0xaa   :  { %973 = vmatpush3.msra.mxu0 %v988_v31 }
  0xab   :  { %975 = vmatmul.mubr.msk.f32.vlgmr.msra.gmra.mxu0 %vm116_vm0, %v22_v32  ;;  %263 = vmatprep.subr.mxu0 %v233_v30 }
  0xac   :  { %264 = vmatpush1.msra.mxu0 %v232_v33  ;;  %307 = vmatprep.mubr.f32.mxu0 %v1013_v50 }
  0xad   :  { %265 = vmatprep.subr.mxu0 %v229_v35  ;;  %v590_v35 = vpop.permute.xlu1 %589 }
  0xae   :  { %266 = vmatpush1.msra.mxu0 %v228_v36 }
  0xaf   :  { %267 = vmatprep.subr.mxu0 %v225_v37 }
  0xb0   :  { %268 = vmatpush1.msra.mxu0 %v224_v38 }
  0xb1   :  { %269 = vmatprep.subr.mxu0 %v221_v40 }
  0xb2   :  { %270 = vmatpush1.msra.mxu0 %v220_v41 }
  0xb3   :  { %271 = vmatprep.subr.mxu0 %v217_v43 }
  0xb4   :  { %272 = vmatpush1.msra.mxu0 %v216_v44 }
  0xb5   :  { %273 = vmatprep.subr.mxu0 %v213_v46 }
  0xb6   :  { %274 = vmatpush1.msra.mxu0 %v212_v47 }
  0xb7   :  { %340 = vmatprep.subr.mxu0 %v235_v49 }
 0x16b   :  { %v976_v52 = vpop.f32.mrf.mxu0 }
 0x16c   :  { %v195_v59 = vadd.f32 %v976_v52, %v114_v56 }
 0x16d   :  { %v189_v53 = vpop.f32.mrf.mxu0 }
 0x16e   :  { %v190_v55 = vadd.f32 %v189_v53, %v109_v51  ;;  %v199_v3 = vmax.f32 %v195_v59, 0.0  ;;  %v585_v51 = vpop.permute.xlu1 %584  ;;  %v613_v59 = vld [vmem:[%s1301_s2 + $0x20] sm:$0xf] }
 0x170   :  { %v198_v60 = vmax.f32 %v190_v55, 0.0 }
 0x172   :  { %916 = vmatmul.mubr.msk.f32.vlgmr.msra.gmra.mxu0 %vm236_vm1, %v198_v60 }
 0x173   :  { %341 = vmatpush1.msra.mxu0 %v234_v57  ;;  %313 = vmatprep.mubr.f32.mxu0 %v1013_v50  ;;  %v614_v57 = vld [vmem:[%s1301_s2 + $0x28] sm:$0xf] }
 0x174   :  { %342 = vmatprep.subr.mxu0 %v231_v61 }
 0x175   :  { %343 = vmatpush1.msra.mxu0 %v230_v62  ;;  %v612_v62 = vld [vmem:[%s1301_s2 + $0x18] sm:$0xff] }
 0x176   :  { %344 = vmatprep.subr.mxu0 %v227_v0  ;;  %917 = vmatmul.mubr.msk.f32.gmra.mxu0 %vm236_vm1, %v199_v3  ;;  %v611_v0 = vld [vmem:[%s1301_s2 + $0x10] sm:$0xff] }
 0x177   :  { %345 = vmatpush1.msra.mxu0 %v226_v1  ;;  %384 = vmatprep.mubr.f32.mxu0 %v1013_v50 }
 0x178   :  { %346 = vmatprep.subr.mxu0 %v223_v4  ;;  %v610_v4 = vld [vmem:[%s1301_s2 + $0x8] sm:$0xff] }
 0x179   :  { %347 = vmatpush1.msra.mxu0 %v222_v5  ;;  %v609_v5 = vld [vmem:[%s1301_s2] sm:$0xff] }
 0x17a   :  { %348 = vmatprep.subr.mxu0 %v219_v7 }
 0x17b   :  { %349 = vmatpush1.msra.mxu0 %v218_v8 }
 0x17c   :  { %350 = vmatprep.subr.mxu0 %v215_v9 }
 0x17d   :  { %351 = vmatpush1.msra.mxu0 %v214_v10  ;;  %v34_v10 = vld [vmem:[%s1302_s3 + $0x78] sm:$0xff] }
 0x17e   :  { %918 = vmatmul.mubr.msk.f32.vlgmr.msra.gmra.mxu0 %vm236_vm1, %v198_v60 }
 0x17f   :  { %390 = vmatprep.mubr.f32.mxu0 %v1013_v50 }
 0x182   :  { %919 = vmatmul.mubr.msk.f32.gmra.mxu0 %vm236_vm1, %v199_v3 }
 0x183   :  { %563 = vmatprep.mubr.f32.mxu0 %v1013_v50 }
 0x232   :  { %v309_v14 = vpop.f32.mrf.mxu0 }
 0x234   :  { %v311_v15 = vpop.f32.mrf.mxu0 }
 0x236   :  { %v315_v16 = vpop.f32.mrf.mxu0 }
 0x238   :  { %v317_v17 = vpop.f32.mrf.mxu0 }
 0x239   :  { %527 = vmatprep.subr.mxu0 %v317_v17  ;;  %v55_v17 = vld [vmem:[%s1302_s3 + $0x120] sm:$0xff] }
 0x23a   :  { %528 = vmatpush1.msra.mxu0 %v315_v16  ;;  %v71_v16 = vld [vmem:[%s1302_s3 + $0x1a0] sm:$0xff] }
 0x23b   :  { %529 = vmatprep.subr.mxu0 %v311_v15  ;;  %v72_v15 = vld [vmem:[%s1302_s3 + $0x1a8] sm:$0xff] }
 0x23c   :  { %530 = vmatpush1.msra.mxu0 %v309_v14  ;;  %v57_v14 = vld [vmem:[%s1302_s3 + $0x130] sm:$0xff] }
 0x23d   :  { %923 = vmatmul.mubr.msk.f32.vlgmr.msra.gmra.mxu0 %vm397_vm2, %v25_v18  ;;  %v70_v18 = vld [vmem:[%s1302_s3 + $0x198] sm:$0xff] }
 0x23e   :  { %v386_v19 = vpop.f32.mrf.mxu0  ;;  %569 = vmatprep.mubr.f32.mxu0 %v1013_v50 }
 0x240   :  { %v388_v21 = vpop.f32.mrf.mxu0 }
 0x241   :  { %924 = vmatmul.mubr.msk.f32.gmra.mxu0 %vm397_vm2, %v26_v20  ;;  %v69_v20 = vld [vmem:[%s1302_s3 + $0x190] sm:$0xff] }
 0x242   :  { %v392_v22 = vpop.f32.mrf.mxu0  ;;  %575 = vmatprep.mubr.f32.mxu0 %v1013_v50 }
 0x244   :  { %v394_v24 = vpop.f32.mrf.mxu0 }
 0x245   :  { %435 = vmatprep.subr.mxu1 %v394_v24  ;;  %925 = vmatmul.mubr.msk.f32.gmra.mxu0 %vm397_vm2, %v27_v23  ;;  %v52_v23 = vld [vmem:[%s1302_s3 + $0x108] sm:$0xff]  ;;  %v67_v24 = vld [vmem:[%s1302_s3 + $0x180] sm:$0xff] }
 0x246   :  { %436 = vmatpush1.msra.mxu1 %v392_v22  ;;  %820 = vmatprep.mubr.f32.mxu0 %v1013_v50  ;;  %v68_v22 = vld [vmem:[%s1302_s3 + $0x188] sm:$0xff] }
 0x247   :  { %437 = vmatprep.subr.mxu1 %v388_v21  ;;  %v53_v21 = vld [vmem:[%s1302_s3 + $0x110] sm:$0xff] }
 0x248   :  { %438 = vmatpush1.msra.mxu1 %v386_v19  ;;  %v54_v19 = vld [vmem:[%s1302_s3 + $0x118] sm:$0xff] }
 0x249   :  { %920 = vmatmul.mubr.msk.f32.vlgmr.msra.gmra.mxu1 %vm397_vm2, %v28_v25  ;;  %v51_v25 = vld [vmem:[%s1302_s3 + $0x100] sm:$0xff] }
 0x24a   :  { %477 = vmatprep.mubr.f32.mxu1 %v1013_v50 }
 0x24d   :  { %921 = vmatmul.mubr.msk.f32.gmra.mxu1 %vm397_vm2, %v29_v26  ;;  %v66_v26 = vld [vmem:[%s1302_s3 + $0x178] sm:$0xff] }
 0x24e   :  { %483 = vmatprep.mubr.f32.mxu1 %v1013_v50 }
 0x251   :  { %922 = vmatmul.mubr.msk.f32.gmra.mxu1 %vm397_vm2, %v30_v27  ;;  %v50_v27 = vld [vmem:[%s1302_s3 + $0xf8] sm:$0xff] }
 0x252   :  { %717 = vmatprep.mubr.f32.mxu1 %v1013_v50 }
 0x2fd   :  { %v565_v28 = vpop.f32.mrf.mxu0 }
 0x2ff   :  { %v567_v29 = vpop.f32.mrf.mxu0 }
 0x301   :  { %v571_v30 = vpop.f32.mrf.mxu0 }
 0x303   :  { %v573_v33 = vpop.f32.mrf.mxu0 }
 0x305   :  { %v577_v37 = vpop.f32.mrf.mxu0 }
 0x307   :  { %v579_v45 = vpop.f32.mrf.mxu0 }
 0x309   :  { %v473_v31 = vpop.f32.mrf.mxu1 }
 0x30a   :  { %v566_v44 = vadd.f32 %v565_v28, %v473_v31  ;;  %v65_v28 = vld [vmem:[%s1302_s3 + $0x170] sm:$0xff]  ;;  %v48_v31 = vld [vmem:[%s1302_s3 + $0xe8] sm:$0xff] }
 0x30b   :  { %v475_v32 = vpop.f32.mrf.mxu1 }
 0x30c   :  { %v568_v41 = vadd.f32 %v567_v29, %v475_v32  ;;  %v597_v55 = vadd.f32 %v585_v51, %v566_v44  ;;  %v49_v29 = vld [vmem:[%s1302_s3 + $0xf0] sm:$0xff]  ;;  %v63_v32 = vld [vmem:[%s1302_s3 + $0x160] sm:$0xff]  ;;  %v629_v44 = vpop.permute.xlu1 %628 }
 0x30d   :  { %v479_v34 = vpop.f32.mrf.mxu1 }
 0x30e   :  { %v572_v39 = vadd.f32 %v571_v30, %v479_v34  ;;  %v598_v53 = vadd.f32 %v585_v51, %v568_v41  ;;  %v603_v2 = vmax.f32 %v597_v55, 0.0  ;;  %v64_v30 = vld [vmem:[%s1302_s3 + $0x168] sm:$0xff]  ;;  %v62_v34 = vld [vmem:[%s1302_s3 + $0x158] sm:$0xff]  ;;  %v634_v41 = vpop.permute.xlu0 %633 }
 0x30f   :  { %v481_v36 = vpop.f32.mrf.mxu1 }
 0x310   :  { %v574_v38 = vadd.f32 %v573_v33, %v481_v36  ;;  %v599_v52 = vadd.f32 %v590_v35, %v572_v39  ;;  %v604_v63 = vmax.f32 %v598_v53, 0.0  ;;  %v615_v9 = vmul.f32 %v609_v5, %v603_v2  ;;  %v47_v33 = vld [vmem:[%s1302_s3 + $0xe0] sm:$0xff]  ;;  %v61_v36 = vld [vmem:[%s1302_s3 + $0x150] sm:$0xff]  ;;  %v42_v2 = vld [vmem:[%s1302_s3 + $0xb8] sm:$0xff] }
 0x311   :  { %v485_v40 = vpop.f32.mrf.mxu1 }
 0x312   :  { %v578_v43 = vadd.f32 %v577_v37, %v485_v40  ;;  %v600_v47 = vadd.f32 %v590_v35, %v574_v38  ;;  %v605_v61 = vmax.f32 %v599_v52, 0.0  ;;  %v616_v8 = vmul.f32 %v610_v4, %v604_v63  ;;  %v46_v35 = vld [vmem:[%s1302_s3 + $0xd8] sm:$0xff]  ;;  %v45_v37 = vld [vmem:[%s1302_s3 + $0xd0] sm:$0xff]  ;;  %v59_v63 = vld [vmem:[%s1302_s3 + $0x140] sm:$0xff]  ;;  %v745_v4 = vpop.permute.xlu1 %744 }
 0x313   :  { %v487_v46 = vpop.f32.mrf.mxu1 }
 0x314   :  { %v601_v48 = vadd.f32 %v595_v42, %v578_v43  ;;  %v580_v49 = vadd.f32 %v579_v45, %v487_v46  ;;  %v606_v58 = vmax.f32 %v600_v47, 0.0  ;;  %v617_v7 = vmul.f32 %v611_v0, %v605_v61  ;;  %v60_v61 = vld [vmem:[%s1302_s3 + $0x148] sm:$0xff]  ;;  %v43_v0 = vld [vmem:[%s1302_s3 + $0xc0] sm:$0xff] }
 0x316   :  { %v602_v54 = vadd.f32 %v595_v42, %v580_v49  ;;  %v607_v56 = vmax.f32 %v601_v48, 0.0  ;;  %v618_v6 = vmul.f32 %v612_v62, %v606_v58  ;;  %v624_v49 = vpop.permute.xlu0 %623  ;;  %v44_v62 = vld [vmem:[%s1302_s3 + $0xc8] sm:$0xff] }
 0x318   :  { %v608_v60 = vmax.f32 %v602_v54, 0.0  ;;  %v619_v3 = vmul.f32 %v613_v59, %v607_v56 }
 0x31a   :  { %v620_v1 = vmul.f32 %v614_v57, %v608_v60  ;;  %v40_v60 = vld [vmem:[%s1302_s3 + $0xa8] sm:$0x1] }
 0x31c   :  { %926 = vmatprep.subr.msk.mxu1 %vm646_vm3, %v620_v1  ;;  %v58_v1 = vld [vmem:[%s1302_s3 + $0x138] sm:$0xff] }
 0x31d   :  { %927 = vmatpush1.msk.msra.mxu1 %vm646_vm3, %v619_v3 }
 0x31e   :  { %681 = vmatprep.subr.mxu1 %v618_v6 }
 0x31f   :  { %682 = vmatpush1.msra.mxu1 %v617_v7 }
 0x320   :  { %683 = vmatprep.subr.mxu1 %v616_v8 }
 0x321   :  { %684 = vmatpush1.msra.mxu1 %v615_v9 }
 0x322   :  { %928 = vmatmul.mubr.msk.f32.vlgmr.msra.gmra.mxu1 %vm636_vm4, %v34_v10  ;;  %937 = vmatprep.subr.mxu1 %v73_v13 }
 0x323   :  { %723 = vmatprep.mubr.f32.mxu1 %v1013_v50  ;;  %938 = vmatpush3.msra.mxu1 %v57_v14 }
 0x324   :  { %939 = vmatprep.subr.mxu1 %v72_v15 }
 0x326   :  { %929 = vmatmul.mubr.msk.f32.gmra.mxu1 %vm636_vm4, %v35_v11 }
 0x327   :  { %729 = vmatprep.mubr.f32.mxu1 %v1013_v50  ;;  %v56_v50 = vld [vmem:[%s1302_s3 + $0x128] sm:$0xff]  ;;  %s993_s3 = scalar_lea.vmem %s906_s22, 32 }
 0x328   :  { %940 = vmatpush3.msra.mxu1 %v56_v50  ;;  %p995_p2 = scmp.lt.s32.totalorder %s993_s3, %s989_s23 }
 0x329   :  { %941 = vmatprep.subr.mxu1 %v71_v16 }
 0x32a   :  { %930 = vmatmul.mubr.msk.f32.gmra.mxu1 %vm636_vm4, %v36_v12  ;;  %p996_p3 = por %p995_p2, %p994_p1 }
 0x32b   :  { %942 = vmatpush3.msra.mxu1 %v55_v17 }
 0x32c   :  { %943 = vmatprep.subr.mxu1 %v70_v18  ;;  %p997_p4 = pnand %p996_p3, %p990_p0 }
 0x32d   :  { %944 = vmatpush3.msra.mxu1 %v54_v19 }
 0x32e   :  { %945 = vmatprep.subr.mxu1 %v69_v20 }
 0x32f   :  { %946 = vmatpush3.msra.mxu1 %v53_v21 }
 0x330   :  { %947 = vmatprep.subr.mxu1 %v68_v22 }
 0x331   :  { %948 = vmatpush3.msra.mxu1 %v52_v23 }
 0x332   :  { %949 = vmatprep.subr.mxu1 %v67_v24 }
 0x333   :  { %950 = vmatpush3.msra.mxu1 %v51_v25 }
 0x334   :  { %951 = vmatprep.subr.mxu1 %v66_v26 }
 0x335   :  { %952 = vmatpush3.msra.mxu1 %v50_v27 }
 0x336   :  { %953 = vmatprep.subr.mxu1 %v65_v28 }
 0x337   :  { %954 = vmatpush3.msra.mxu1 %v49_v29 }
 0x338   :  { %955 = vmatprep.subr.mxu1 %v64_v30 }
 0x339   :  { %956 = vmatpush3.msra.mxu1 %v48_v31 }
 0x33a   :  { %957 = vmatprep.subr.mxu1 %v63_v32 }
 0x33b   :  { %958 = vmatpush3.msra.mxu1 %v47_v33 }
 0x33c   :  { %959 = vmatprep.subr.mxu1 %v62_v34 }
 0x33d   :  { %960 = vmatpush3.msra.mxu1 %v46_v35 }
 0x33e   :  { %961 = vmatprep.subr.mxu1 %v61_v36 }
 0x33f   :  { %962 = vmatpush3.msra.mxu1 %v45_v37 }
 0x340   :  { %963 = vmatprep.subr.mxu1 %v60_v61 }
 0x341   :  { %964 = vmatpush3.msra.mxu1 %v44_v62 }
 0x342   :  { %965 = vmatprep.subr.mxu1 %v59_v63 }
 0x343   :  { %966 = vmatpush3.msra.mxu1 %v43_v0 }
 0x344   :  { %967 = vmatprep.subr.mxu1 %v58_v1 }
 0x345   :  { %968 = vmatpush3.msra.mxu1 %v42_v2 }
 0x3e2   :  { %v719_v38 = vpop.f32.mrf.mxu1 }
 0x3e3   :  { %v720_v54 = vadd.f32 %v719_v38, %v624_v49 }
 0x3e4   :  { %v721_v39 = vpop.f32.mrf.mxu1 }
 0x3e5   :  { %v722_v52 = vadd.f32 %v721_v39, %v624_v49  ;;  %v736_v59 = vmax.f32 %v720_v54, 0.0 }
 0x3e6   :  { %v725_v40 = vpop.f32.mrf.mxu1 }
 0x3e7   :  { %v726_v51 = vadd.f32 %v725_v40, %v629_v44  ;;  %v737_v58 = vmax.f32 %v722_v52, 0.0 }
 0x3e8   :  { %v727_v42 = vpop.f32.mrf.mxu1 }
 0x3e9   :  { %v728_v47 = vadd.f32 %v727_v42, %v629_v44  ;;  %v738_v57 = vmax.f32 %v726_v51, 0.0 }
 0x3ea   :  { %v731_v43 = vpop.f32.mrf.mxu1 }
 0x3eb   :  { %v732_v45 = vadd.f32 %v731_v43, %v634_v41  ;;  %v739_v56 = vmax.f32 %v728_v47, 0.0 }
 0x3ec   :  { %v733_v46 = vpop.f32.mrf.mxu1 }
 0x3ed   :  { %v734_v48 = vadd.f32 %v733_v46, %v634_v41  ;;  %v740_v55 = vmax.f32 %v732_v45, 0.0 }
 0x3ef   :  { %v741_v53 = vmax.f32 %v734_v48, 0.0 }
 0x3f1   :  { %931 = vmatprep.subr.msk.mxu0 %vm646_vm3, %v741_v53 }
 0x3f2   :  { %932 = vmatpush1.msk.msra.mxu0 %vm646_vm3, %v740_v55 }
 0x3f3   :  { %784 = vmatprep.subr.mxu0 %v739_v56 }
 0x3f4   :  { %785 = vmatpush1.msra.mxu0 %v738_v57 }
 0x3f5   :  { %786 = vmatprep.subr.mxu0 %v737_v58 }
 0x3f6   :  { %787 = vmatpush1.msra.mxu0 %v736_v59 }
 0x3f7   :  { %933 = vmatmul.mubr.msk.f32.vlgmr.msra.gmra.mxu0 %vm636_vm4, %v40_v60 }
 0x4b7   :  { %v822_v3 = vpop.f32.mrf.mxu0 }
 0x4b8   :  { %v823_v7 = vadd.f32 %v822_v3, %v745_v4 }
 0x4b9   :  { %v824_v5 = vpop.f32.mrf.mxu0 }
 0x4ba   :  { %v825_v6 = vadd.f32 %v824_v5, %v745_v4 }
 0x4bc   :  { %891 = vmatprep.mubr.f32.mxu1 %v825_v6 }
 0x4bd   :  { %892 = vmatmul.mubr.f32.vlgmr.msra.gmra.mxu1 %v823_v7 }
 0x57d   :  { %v969_v8 = vpop.f32.mrf.mxu1 }
 0x57f   :  { %v970_v9 = vpop.f32.mrf.mxu1 }
 0x580   :  { %v971_v10 = vadd.f32 %v970_v9, %v969_v8 }
 0x582   :  { %898 = vst.msk [vmem:[#allocation2] sm:$0x1] %vm897_vm5, %v971_v10 }
 0x583   :  { %1000 = shalt.err (!%p997_p4)
}
 0x584   :  { %908 = dma.vmem_to_hbm [thread:$0]  %s906_s22, 16, %s1303_s4, [#allocation3]  }
 0x585   :  { %1009 = dma.done.wait [#allocation3], 16  }
 0x586   :  { %1010 = vsyncadd [#allocation3], 4294967280 }
 0x587   :  { %912 = vsyncpa [#allocation3], 1 }

</bundles_post_ra>
